<compile_context>
chip_gen: v6e
topology: v6e:2x2x1
jax: 0.10.0
libtpu: 0.0.40
codegen_flags: <defaults>
</compile_context>

<pallas_src>
import functools

import jax
import jax.numpy as jnp
from jax import lax
from jax.experimental import pallas as pl
from jax.experimental.pallas import tpu as pltpu


def _round_up(x, m):
    return ((x + m - 1) // m) * m


def _vmem_capacity_bytes():
    """Physical VMEM per TensorCore (128 MiB v5e/v6e, 64 MiB v7x)."""
    try:
        info = pltpu.get_tpu_info()
        cap = getattr(info, "vmem_capacity_bytes", None)
        if cap:
            return int(cap)
    except Exception:
        pass
    return 64 * 1024 * 1024  # conservative fallback (v7x per-TC)


# =============================================================================
# Pallas kernel 1: fused pairwise squared distance + radius threshold for BOTH
# scales, emitting negated sort keys so the selection outside is a single
# lax.top_k instead of a full sort.
#   q_aug : [B, N, 5]  rows  [-2x, -2y, -2z, ||p||^2, 1]   tiled (1, TQ, 5)
#   k_aug : [B, 5, N]  rows  [ x,   y,   z,  1, ||p||^2]   full  (1, 5, N)
#   d[i,j] = q_aug[i] . k_aug[:,j] = ||p_i||^2 - 2 p_i.p_j + ||p_j||^2
#   out   : key = -j if d <= r^2 else -N   (int16 when N < 32768)
# The f32 [TQ, N] distance tile lives only in VMEM/vregs.
# =============================================================================
def _group_key_kernel(q_ref, k_ref, gs_ref, gl_ref, *, r2_small, r2_large, sentinel):
    q = q_ref[0]                                           # [TQ, 5]
    k = k_ref[0]                                           # [5, N] lane-dense
    d = jnp.dot(q, k, preferred_element_type=jnp.float32)  # [TQ, N] sq. distances (MXU)
    col = lax.broadcasted_iota(jnp.int32, d.shape, 1)      # global key index
    neg_sent = jnp.int32(-sentinel)
    # In-radius (d <= r^2) keeps -index, else -N; top_k(largest) == smallest idx.
    gs_ref[0] = jnp.where(d <= r2_small, -col, neg_sent).astype(gs_ref.dtype)
    gl_ref[0] = jnp.where(d <= r2_large, -col, neg_sent).astype(gl_ref.dtype)


def _pick_tq(n, batch, out_itemsize, budget_bytes):
    """Largest query-row tile whose per-step footprint (2 double-buffered
    outputs + f32 distance intermediate + query/key tiles) fits the VMEM
    budget, while keeping >= 2 total grid steps so both v7x cores get work."""
    def footprint(tq):
        out_b = 2 * 2 * tq * n * out_itemsize     # 2 outputs x double buffer
        dist_b = 4 * tq * n                       # f32 distance scratch
        q_b = 2 * tq * 5 * 4                      # query tile, double buffered
        k_b = 2 * 5 * n * 4                       # resident keys
        return out_b + dist_b + q_b + k_b

    for tq in (1024, 512, 256, 128, 64, 32, 16):  # multiples of 16 (int16-safe)
        if tq > n:
            continue
        if footprint(tq) > budget_bytes:
            continue
        if batch * ((n + tq - 1) // tq) < 2 and tq > 16:
            continue                              # leave >= 2 steps for megacore
        return tq
    return n if n < 16 else 16


def group_keys(xyz, small_radius, large_radius):
    """xyz: [B, N, 3] -> (neg_keys_small, neg_keys_large), each [B, N, N].

    neg_keys[b,i,j] = -j if ||p_i - p_j||^2 <= r^2 else -N, so that
    lax.top_k(neg_keys, S) yields the S smallest in-radius indices in ascending
    order — exactly the reference sort(group_idx)[..., :S]."""
    B, N, _ = xyz.shape
    r2s = float(small_radius) ** 2
    r2l = float(large_radius) ** 2
    idx_dtype = jnp.int16 if N < 32768 else jnp.int32   # halve HBM write traffic
    itemsize = jnp.dtype(idx_dtype).itemsize

    cap = _vmem_capacity_bytes()
    budget = cap // 2                                    # per-step footprint budget
    vmem_limit = max(32 << 20, min(cap * 3 // 4, 100 << 20))
    TQ = _pick_tq(N, B, itemsize, budget)

    xyz = xyz.astype(jnp.float32)
    sq = jnp.sum(xyz * xyz, axis=-1, keepdims=True)      # [B, N, 1]
    ones = jnp.ones_like(sq)
    q_aug = jnp.concatenate([-2.0 * xyz, sq, ones], axis=-1)                      # [B, N, 5]
    k_aug = jnp.transpose(jnp.concatenate([xyz, ones, sq], axis=-1), (0, 2, 1))   # [B, 5, N]

    kernel = functools.partial(_group_key_kernel,
                               r2_small=r2s, r2_large=r2l, sentinel=N)
    gs, gl = pl.pallas_call(
        kernel,
        out_shape=(jax.ShapeDtypeStruct((B, N, N), idx_dtype),
                   jax.ShapeDtypeStruct((B, N, N), idx_dtype)),
        grid=(B, pl.cdiv(N, TQ)),                        # cdiv: no TQ=N fallback cliff
        in_specs=[
            pl.BlockSpec((1, TQ, 5), lambda b, q: (b, q, 0)),   # query rows
            pl.BlockSpec((1, 5, N), lambda b, q: (b, 0, 0)),    # all keys (lane-dense, tiny)
        ],
        out_specs=(
            pl.BlockSpec((1, TQ, N), lambda b, q: (b, q, 0)),
            pl.BlockSpec((1, TQ, N), lambda b, q: (b, q, 0)),
        ),
        compiler_params=pltpu.CompilerParams(
            dimension_semantics=("parallel", "parallel"),
            vmem_limit_bytes=vmem_limit),
    )(q_aug, k_aug)
    return gs, gl


# =============================================================================
# Pallas kernel 2: fused per-point MLP (Conv1d k=1 + BN(eval) + ReLU) x4,
# channels 1 -> 16 -> 32 -> 16 -> 1.  Points lane-dense on [1, TM] tiles.
# =============================================================================
def _mlp_kernel(c_ref, w_ref, b_ref, o_ref):
    h = c_ref[...]                                        # [1, TM]
    w1 = w_ref[0:16, 0:1]                                 # [16, 1]
    w2 = w_ref[16:48, 0:16]                               # [32, 16]
    w3 = w_ref[48:64, 0:32]                               # [16, 32]
    w4t = w_ref[64:80, 0:1]                               # [16, 1] (conv4 weight^T)
    b1 = b_ref[0:16, 0:1]
    b2 = b_ref[16:48, 0:1]
    b3 = b_ref[48:64, 0:1]
    b4 = b_ref[64:65, 0:1]
    h1 = jnp.maximum(w1 * h + b1, 0.0)                    # VPU broadcast mul-add
    h2 = jnp.maximum(jnp.dot(w2, h1, preferred_element_type=jnp.float32) + b2, 0.0)
    h3 = jnp.maximum(jnp.dot(w3, h2, preferred_element_type=jnp.float32) + b3, 0.0)
    o_ref[...] = jnp.sum(w4t * h3, axis=0, keepdims=True) + b4   # sublane reduce


def freq_mlp(curv, packed_params):
    """curv: [B, N] -> [B, N] through the fused (conv+bn+relu)x4 point MLP."""
    B, N = curv.shape
    M = B * N
    MAX_TM = 32768                      # ~10 MiB live per step, fits every generation
    if M <= 256:
        TM = _round_up(M, 128)
    elif M <= 2 * MAX_TM:
        TM = _round_up((M + 1) // 2, 128)   # 2 grid steps -> both v7x cores busy
    else:
        TM = MAX_TM
    Mp = _round_up(M, TM)
    x = curv.reshape(1, M).astype(jnp.float32)
    if Mp != M:
        x = jnp.pad(x, ((0, 0), (0, Mp - M)))             # zero-pad, sliced off below
    wpack, bpack = packed_params
    out = pl.pallas_call(
        _mlp_kernel,
        out_shape=jax.ShapeDtypeStruct((1, Mp), jnp.float32),
        grid=(Mp // TM,),
        in_specs=[
            pl.BlockSpec((1, TM), lambda i: (0, i)),
            pl.BlockSpec(wpack.shape, lambda i: (0, 0)),  # constant, stays resident
            pl.BlockSpec(bpack.shape, lambda i: (0, 0)),
        ],
        out_specs=pl.BlockSpec((1, TM), lambda i: (0, i)),
        compiler_params=pltpu.CompilerParams(
            dimension_semantics=("parallel",),
            vmem_limit_bytes=48 * 1024 * 1024),
    )(x, wpack, bpack)
    return out[0, :M].reshape(B, N)


# =============================================================================
# Plain-JAX geometry around the Pallas kernels (selection / gather / eigh).
# =============================================================================
def _normals_from_neg_keys(xyz, neg_keys, nsample):
    """xyz: [B,N,3], neg_keys: [B,N,N] -> smallest-eigenvector normals [B,N,3]."""
    B, N, _ = xyz.shape
    S = min(nsample, N)
    # TODO(synk): top_k, gather (index_points) and batched 3x3 eigh stay in
    # plain JAX/XLA; an in-kernel first-S compaction would remove the [B,N,N]
    # HBM round-trip entirely.
    vals, _ = lax.top_k(neg_keys, S)                      # largest keys == smallest indices
    gi = -vals.astype(jnp.int32)                          # [B,N,S] ascending, N = sentinel
    first = gi[:, :, :1]
    gi = jnp.where(gi == N, first, gi)                    # pad with first neighbor
    batch_ids = jnp.arange(B, dtype=jnp.int32)[:, None, None]
    pts = xyz[batch_ids, gi]                              # [B, N, S, 3]
    center = jnp.mean(pts, axis=2, keepdims=True)
    centered = pts - center
    cov = jnp.einsum('bnsc,bnsd->bncd', centered, centered)   # [B, N, 3, 3]
    # NOTE: eigenvector sign is arbitrary (same ambiguity as the torch reference).
    _, eigvecs = jnp.linalg.eigh(cov)
    return eigvecs[..., 0]                                # smallest-eig vector


def get_curvate(pointcloud, large_scale, small_scale):
    points = pointcloud[:, :, :3].astype(jnp.float32)
    # One fused kernel pass produces the thresholded sort keys for BOTH radii.
    neg_small, neg_large = group_keys(points, small_scale, large_scale)
    small_n = _normals_from_neg_keys(points, neg_small, 32)
    large_n = _normals_from_neg_keys(points, neg_large, 64)
    diff_normals = (small_n - large_n) / 2.0
    return jnp.linalg.norm(diff_normals, axis=2)          # [B, N]


# =============================================================================
# Deterministic parameter init (Conv1d k=1 + BatchNorm1d eval), BN folding, and
# packing into the two constant kernel buffers.
# =============================================================================
def _conv_init(key, cout, cin):
    bound = 1.0 / (cin ** 0.5)
    kw, kb = jax.random.split(key)
    w = jax.random.uniform(kw, (cout, cin), minval=-bound, maxval=bound, dtype=jnp.float32)
    b = jax.random.uniform(kb, (cout,), minval=-bound, maxval=bound, dtype=jnp.float32)
    return w, b


def _bn_init(key, c):
    k1, k2, k3 = jax.random.split(key, 3)
    gamma = 1.0 + 0.1 * jax.random.normal(k1, (c,), dtype=jnp.float32)
    beta = 0.1 * jax.random.normal(k2, (c,), dtype=jnp.float32)
    mean = 0.1 * jax.random.normal(k3, (c,), dtype=jnp.float32)
    var = jnp.ones((c,), jnp.float32)
    return gamma, beta, mean, var


def _fold_conv_bn(conv, bn, eps=1e-5):
    w, b = conv
    gamma, beta, mean, var = bn
    scale = gamma / jnp.sqrt(var + eps)
    w_eff = w * scale[:, None]
    b_eff = (b - mean) * scale + beta
    return w_eff, b_eff[:, None]          # bias as [C_out, 1] for lane-broadcast


def pack_folded_params(folded):
    (w1, b1), (w2, b2), (w3, b3), (w4, b4) = folded
    wpack = jnp.zeros((80, 128), jnp.float32)
    wpack = wpack.at[0:16, 0:1].set(w1)            # conv1: [16, 1]
    wpack = wpack.at[16:48, 0:16].set(w2)          # conv2: [32, 16]
    wpack = wpack.at[48:64, 0:32].set(w3)          # conv3: [16, 32]
    wpack = wpack.at[64:80, 0:1].set(w4.T)         # conv4: [1, 16] stored transposed
    bpack = jnp.zeros((72, 128), jnp.float32)
    bpack = bpack.at[0:16, 0:1].set(b1)
    bpack = bpack.at[16:48, 0:1].set(b2)
    bpack = bpack.at[48:64, 0:1].set(b3)
    bpack = bpack.at[64:65, 0:1].set(b4)
    return wpack, bpack


def init_packed_params(key):
    ks = jax.random.split(key, 8)
    dims = [(16, 1), (32, 16), (16, 32), (1, 16)]
    folded = []
    for i, (cout, cin) in enumerate(dims):
        conv = _conv_init(ks[2 * i], cout, cin)
        bn = _bn_init(ks[2 * i + 1], cout)
        folded.append(_fold_conv_bn(conv, bn))
    return pack_folded_params(tuple(folded))


# =============================================================================
# Full forward pass of FreqExtractMoudle.
# =============================================================================
def freq_extract_forward(x, small, large, packed_params):
    # x: [B, N, D] with D >= 3 (point features; first 3 are xyz)
    pointxyz = x[:, :, :3]
    curvates = get_curvate(pointxyz, large, small)        # [B, N]
    out = freq_mlp(curvates, packed_params)               # [B, N] (== squeeze(dim=1))
    return out


if __name__ == "__main__":
    key = jax.random.PRNGKey(0)
    kx, kp = jax.random.split(key)
    B, N, D = 2, 256, 6
    x = jax.random.normal(kx, (B, N, D), dtype=jnp.float32)
    packed_params = init_packed_params(kp)
    small, large = 1.0, 2.0

    out = freq_extract_forward(x, small, large, packed_params)
    out = jax.block_until_ready(out)
    assert out.shape == (B, N), out.shape
    assert jnp.all(jnp.isfinite(out))
    print("KERNEL_OK")
</pallas_src>

<mosaic_0001>
module attributes {stable_mosaic.version = 11 : i64} {
  func.func @_group_key_kernel(%arg0: i32, %arg1: i32, %arg2: memref<1x256x5xf32, #tpu.memory_space<vmem>>, %arg3: memref<1x5x256xf32, #tpu.memory_space<vmem>>, %arg4: memref<1x256x256xi16, #tpu.memory_space<vmem>>, %arg5: memref<1x256x256xi16, #tpu.memory_space<vmem>>) attributes {dimension_semantics = [#tpu.dimension_semantics<parallel>, #tpu.dimension_semantics<parallel>], iteration_bounds = array<i64: 2, 1>, scalar_prefetch = 0 : i64, scratch_operands = 0 : i64, tpu.core_type = #tpu.core_type<tc>, window_params = [{transform_indices = @transform_0, window_bounds = array<i64: 1, 256, 5>}, {transform_indices = @transform_1, window_bounds = array<i64: 1, 5, 256>}, {transform_indices = @transform_2, window_bounds = array<i64: 1, 256, 256>}, {transform_indices = @transform_3, window_bounds = array<i64: 1, 256, 256>}]} {
    %c0 = arith.constant 0 : index
    %c0_0 = arith.constant 0 : index
    %c0_1 = arith.constant 0 : index
    %0 = vector.load %arg2[%c0, %c0_0, %c0_1] : memref<1x256x5xf32, #tpu.memory_space<vmem>>, vector<1x256x5xf32>
    %1 = vector.shape_cast %0 : vector<1x256x5xf32> to vector<256x5xf32>
    %c0_2 = arith.constant 0 : index
    %c0_3 = arith.constant 0 : index
    %c0_4 = arith.constant 0 : index
    %2 = vector.load %arg3[%c0_2, %c0_3, %c0_4] : memref<1x5x256xf32, #tpu.memory_space<vmem>>, vector<1x5x256xf32>
    %3 = vector.shape_cast %2 : vector<1x5x256xf32> to vector<5x256xf32>
    %cst = arith.constant dense<0.000000e+00> : vector<256x256xf32>
    %4 = tpu.matmul %1, %3, %cst {dimension_numbers = #tpu.dot_dimension_numbers<[1], [0], [0], [1], [0, 0, 1, 1], [], []>} : vector<256x5xf32>, vector<5x256xf32>, vector<256x256xf32> -> vector<256x256xf32>
    %5 = tpu.iota {dimensions = array<i32: 1>} : vector<256x256xi32>
    %cst_5 = arith.constant 1.000000e+00 : f32
    %6 = vector.broadcast %cst_5 : f32 to vector<256x256xf32>
    %7 = arith.cmpf ole, %4, %6 : vector<256x256xf32>
    %c0_i32 = arith.constant 0 : i32
    %8 = vector.broadcast %c0_i32 : i32 to vector<256x256xi32>
    %9 = arith.subi %8, %5 : vector<256x256xi32>
    %c-256_i32 = arith.constant -256 : i32
    %10 = vector.broadcast %c-256_i32 : i32 to vector<256x256xi32>
    %11 = arith.select %7, %9, %10 : vector<256x256xi1>, vector<256x256xi32>
    %12 = arith.trunci %11 : vector<256x256xi32> to vector<256x256xi16>
    %c0_6 = arith.constant 0 : index
    %c0_7 = arith.constant 0 : index
    %c0_8 = arith.constant 0 : index
    %13 = vector.load %arg4[%c0_6, %c0_7, %c0_8] : memref<1x256x256xi16, #tpu.memory_space<vmem>>, vector<1x256x256xi16>
    %14 = vector.shape_cast %13 : vector<1x256x256xi16> to vector<256x256xi16>
    %15 = vector.shape_cast %12 : vector<256x256xi16> to vector<1x256x256xi16>
    tpu.vector_store %arg4[%c0_6, %c0_7, %c0_8], %15 {strides = array<i32>} : memref<1x256x256xi16, #tpu.memory_space<vmem>>, vector<1x256x256xi16>,
    %cst_9 = arith.constant 4.000000e+00 : f32
    %16 = vector.broadcast %cst_9 : f32 to vector<256x256xf32>
    %17 = arith.cmpf ole, %4, %16 : vector<256x256xf32>
    %c0_i32_10 = arith.constant 0 : i32
    %18 = vector.broadcast %c0_i32_10 : i32 to vector<256x256xi32>
    %19 = arith.subi %18, %5 : vector<256x256xi32>
    %c-256_i32_11 = arith.constant -256 : i32
    %20 = vector.broadcast %c-256_i32_11 : i32 to vector<256x256xi32>
    %21 = arith.select %17, %19, %20 : vector<256x256xi1>, vector<256x256xi32>
    %22 = arith.trunci %21 : vector<256x256xi32> to vector<256x256xi16>
    %c0_12 = arith.constant 0 : index
    %c0_13 = arith.constant 0 : index
    %c0_14 = arith.constant 0 : index
    %23 = vector.load %arg5[%c0_12, %c0_13, %c0_14] : memref<1x256x256xi16, #tpu.memory_space<vmem>>, vector<1x256x256xi16>
    %24 = vector.shape_cast %23 : vector<1x256x256xi16> to vector<256x256xi16>
    %25 = vector.shape_cast %22 : vector<256x256xi16> to vector<1x256x256xi16>
    tpu.vector_store %arg5[%c0_12, %c0_13, %c0_14], %25 {strides = array<i32>} : memref<1x256x256xi16, #tpu.memory_space<vmem>>, vector<1x256x256xi16>,
    return
  }
  func.func @transform_0(%arg0: i32, %arg1: i32) -> (i32, i32, i32) {
    %c0_i32 = arith.constant 0 : i32
    %c0_i32_0 = arith.constant 0 : i32
    return %arg0, %arg1, %c0_i32 : i32, i32, i32
  }
  func.func @transform_1(%arg0: i32, %arg1: i32) -> (i32, i32, i32) {
    %c0_i32 = arith.constant 0 : i32
    %c0_i32_0 = arith.constant 0 : i32
    %c0_i32_1 = arith.constant 0 : i32
    return %arg0, %c0_i32, %c0_i32_0 : i32, i32, i32
  }
  func.func @transform_2(%arg0: i32, %arg1: i32) -> (i32, i32, i32) {
    %c0_i32 = arith.constant 0 : i32
    %c0_i32_0 = arith.constant 0 : i32
    return %arg0, %arg1, %c0_i32 : i32, i32, i32
  }
  func.func @transform_3(%arg0: i32, %arg1: i32) -> (i32, i32, i32) {
    %c0_i32 = arith.constant 0 : i32
    %c0_i32_0 = arith.constant 0 : i32
    return %arg0, %arg1, %c0_i32 : i32, i32, i32
  }
}

</mosaic_0001>

<bundles_post_ra>
// kernel: tpu_custom_call.1
= control target key start
LH: loop header
LB: loop body
LE: loop exit
PB: predicated region body
PF: predicated region fallthrough
CT: control target
= control target key end

     0   :  { %9 = vsyncpa [#allocation3], 0  ;;  %s1966_s0 = inlined_call_operand.vmem [shape: f32[2,256,5], index: 0, kind: input, shape index: {}]   ;;  %s1967_s1 = inlined_call_operand.vmem [shape: f32[2,5,256], index: 1, kind: input, shape index: {}]   ;;  %s1968_s2 = inlined_call_operand.hbm [shape: s16[2,256,256], index: 2, kind: output, shape index: {0}]   ;;  %s1969_s3 = inlined_call_operand.hbm [shape: s16[2,256,256], index: 3, kind: output, shape index: {1}]  }
   0x1   :  { %11 = vsyncpa [#allocation3 + $0x1], 0 }
   0x2   :  { %12 = vsyncpa [#allocation5], 0 }
   0x3   :  { %14 = vsyncpa [#allocation5 + $0x1], 0  ;;  %s1440_s12 = smov 0   ;;  %s1442_s13 = smov 0  }
   0x4   :  { %s1444_s14 = smov 0   ;;  %s1446_s15 = smov 0  }
   0x5   :  { %s1448_s16 = smov 0   ;;  %s1450_s17 = smov 0  }
   0x6 LB: > { %s1185_s18 = sadd.s32 4294967295, %s1413_s17   ;;  %s1186_s19 = sadd.s32 4294967294, %s1413_s17   ;;  %s1413_s17 = sphi %s1450_s17, %s20_s17   ;;  %s1409_s16 = sphi %s1448_s16, %s1976_s16   ;;  %s1405_s15 = sphi %s1446_s15, %s1975_s15   ;;  %s1401_s14 = sphi %s1444_s14, %s1974_s14   ;;  %s1397_s13 = sphi %s1442_s13, %s1973_s13   ;;  %s1393_s12 = sphi %s1440_s12, %s1972_s12  }
   0x7   : > { %s32_s20 = sadd.s32 1, %s1409_s16  ;;  %s95_s21 = sadd.s32 1, %s1401_s14 }
   0x8   : > { %p34_p0 = scmp.ge.s32.totalorder %s32_s20, 2  ;;  %p105_p1 = scmp.ne.s32.totalorder %s1401_s14, %s1397_s13 }
   0x9   : > { %p106_p2 = scmp.eq.s32.totalorder %s1185_s18, 1  ;;  %p111_p3 = scmp.ne.s32.totalorder %s1397_s13, %s1393_s12 }
   0xa   : > { %s1978_s20 = smov (%p34_p0, %s32_s20), 0  ;;  %p112_p5 = scmp.eq.s32.totalorder %s1186_s19, 1 }
   0xb   : > { %p1480_p4 = por %p106_p2, %p105_p1  ;;  %s90_s23 = ssub.s32 %s1409_s16, %s1978_s20 }
   0xc   : > { %p1189_p6 = scmp.ge.s32.totalorder %s1413_s17, 1  ;;  %p93_p7 = scmp.eq.s32.totalorder %s90_s23, 0 }
   0xd   : > { %p1487_p8 = por %p112_p5, %p111_p3  ;;  %p179_p9 = scmp.lt.s32.totalorder %s1413_s17, 3 }
   0xe   : > { %s1493_s25 = scalar_select %p93_p7, %s1401_s14, %s95_s21  }
   0xf   : > { %p180_p10 = pnand %p1189_p6, %p179_p9 }
  0x10   : > { %p218_p11 = scmp.lt.s32.totalorder (!%p180_p10), %s1405_s15, 1  ;;  %s1604_s8 = sand.u32 (!%p180_p10), 1, %s1397_s13  }
  0x11   : > { %183 = sbr.rel (%p180_p10) target bundleno = 340 (0x154), region = 28  ;;  %s1190_s9 = sshll.u32 (!%p180_p10), %s1604_s8, 8 }
  0x12   : > { %s1617_s10 = scalar_lea.vmem (!%p180_p10), [#allocation2], %s1190_s9  ;;  %s1620_s11 = scalar_lea.vmem (!%p180_p10), [#allocation4], %s1190_s9 }
  0x13   : > { %s1240_s18 = sshll.u32 (!%p180_p10), %s1405_s15, 12  ;;  %s1040_s19 = sshll.u32 (!%p180_p10), %s1617_s10, 4  ;;  %s1879_s19 = int_to_ptr.vmem [resolvable:$true] %s1040_s19 }
  0x14   : > { %s1886_s30 = scalar_lea.hbm (!%p180_p10), %s1969_s3, %s1240_s18  ;;  %s1307_s5 = scalar_lea.vmem (!%p180_p10), %s1879_s19, 4096 }
  0x15   : > { %p1308_p12 = scmp.ne.s32.totalorder (!%p180_p10), %s1879_s19, %s1307_s5  ;;  %s1416_s6 = smov (!%p180_p10), [#allocation2]  }
  0x16   : > { %v1415_v0 = vmov 0.0   ;;  %s219_s26 = scalar_select %p218_p11, %s1405_s15, 1  ;;  %vm365_vm0 = vcmask 1044480   ;;  %vm268_vm1 = vcmask 39936   ;;  %v629_v35 = vlaneseq }
  0x17   : > { %436 = vmatprep.mubr.f32.mxu0 %v1415_v0  ;;  %532 = vmatprep.mubr.f32.mxu1 %v1415_v0  ;;  %p1309_p13 = pnand %p1308_p12, %p1480_p4  ;;  %s1311_s15 = sshll.u32 %s1416_s6, 4  ;;  %s1312_s15 = int_to_ptr.vmem [resolvable:$false] %s1311_s15 }
  0x18   : > { %s1238_s27 = sshll.u32 %s219_s26, 8  ;;  %s1239_s28 = sshll.u32 %s219_s26, 4  ;;  %v630_v36 = vand.u32 127, %v629_v35 }
  0x19   : > { %s1502_s4 = scalar_lea.vmem %s1966_s0, %s1238_s27  ;;  %s231_s7 = scalar_lea.vmem %s1967_s1, %s1239_s28 }
  0x1a   : > { %v267_v1 = vld [vmem:[%s231_s7 + $0x8] sm:$0x1f]  ;;  %v266_v2 = vld [vmem:[%s231_s7] sm:$0x1f]  ;;  %v236_v7 = vld [vmem:[%s1502_s4 + $0x10] sm:$0xff]  ;;  %v631_v37 = vadd.s32 128, %v630_v36  ;;  %s1872_s26 = scalar_lea.hbm %s1968_s2, %s1240_s18  ;;  %p1310_p0 = pneg %p1309_p13 }
  0x1b   : > { %v234_v3 = vld [vmem:[%s1502_s4] sm:$0xff]  ;;  %1196 = vmatprep.subr.msk.mxu0 %vm365_vm0, %v267_v1  ;;  %1242 = vmatprep.subr.msk.mxu1 %vm365_vm0, %v267_v1  ;;  %v235_v5 = vld [vmem:[%s1502_s4 + $0x8] sm:$0xff]  ;;  %v252_v8 = vld [vmem:[%s1502_s4 + $0x90] sm:$0xff]  ;;  %v1601_v38 = vsub.s32 0, %v630_v36  ;;  %s1059_s27 = sshll.u32 %s1620_s11, 4  ;;  %s1313_s7 = scalar_lea.vmem %s1312_s15, 8192  ;;  %s1888_s27 = int_to_ptr.vmem [resolvable:$true] %s1059_s27 }
  0x1c   : > { %v250_v4 = vld [vmem:[%s1502_s4 + $0x80] sm:$0xff]  ;;  %1197 = vmatpush1.msk.msra.mxu0 %vm365_vm0, %v266_v2  ;;  %1243 = vmatpush1.msk.msra.mxu1 %vm365_vm0, %v266_v2  ;;  %v251_v6 = vld [vmem:[%s1502_s4 + $0x88] sm:$0xff]  ;;  %v237_v9 = vld [vmem:[%s1502_s4 + $0x18] sm:$0xff]  ;;  %v1606_v41 = vsub.s32 0, %v631_v37  ;;  %p1314_p1 = scmp.lt.s32.totalorder %s1879_s19, %s1312_s15  ;;  %p1315_p2 = scmp.lt.s32.totalorder %s1313_s7, %s1307_s5 }
  0x1d   : > { %1198 = vmatmul.mubr.msk.f32.vlgmr.msra.gmra.mxu0 %vm268_vm1, %v234_v3  ;;  %1214 = vmatmul.mubr.msk.f32.vlgmr.msra.gmra.mxu1 %vm268_vm1, %v250_v4  ;;  %v253_v10 = vld [vmem:[%s1502_s4 + $0x98] sm:$0xff]  ;;  %v238_v11 = vld [vmem:[%s1502_s4 + $0x20] sm:$0xff]  ;;  %v239_v13 = vld [vmem:[%s1502_s4 + $0x28] sm:$0xff] }
  0x1e   : > { %442 = vmatprep.mubr.f32.mxu0 %v1415_v0  ;;  %538 = vmatprep.mubr.f32.mxu1 %v1415_v0  ;;  %v254_v12 = vld [vmem:[%s1502_s4 + $0xa0] sm:$0xff]  ;;  %v255_v14 = vld [vmem:[%s1502_s4 + $0xa8] sm:$0xff]  ;;  %v240_v15 = vld [vmem:[%s1502_s4 + $0x30] sm:$0xff]  ;;  %p1316_p3 = por %p1315_p2, %p1314_p1 }
  0x1f   : > { %v256_v16 = vld [vmem:[%s1502_s4 + $0xb0] sm:$0xff]  ;;  %v241_v17 = vld [vmem:[%s1502_s4 + $0x38] sm:$0xff]  ;;  %v242_v19 = vld [vmem:[%s1502_s4 + $0x40] sm:$0xff] }
  0x20   : > { %v257_v18 = vld [vmem:[%s1502_s4 + $0xb8] sm:$0xff]  ;;  %v258_v20 = vld [vmem:[%s1502_s4 + $0xc0] sm:$0xff]  ;;  %v243_v21 = vld [vmem:[%s1502_s4 + $0x48] sm:$0xff]  ;;  %p1317_p5 = pnand %p1316_p3, %p1310_p0 }
  0x21   : > { %1199 = vmatmul.mubr.msk.f32.gmra.mxu0 %vm268_vm1, %v235_v5  ;;  %1215 = vmatmul.mubr.msk.f32.gmra.mxu1 %vm268_vm1, %v251_v6  ;;  %v259_v22 = vld [vmem:[%s1502_s4 + $0xc8] sm:$0xff]  ;;  %v244_v23 = vld [vmem:[%s1502_s4 + $0x50] sm:$0xff]  ;;  %v245_v25 = vld [vmem:[%s1502_s4 + $0x58] sm:$0xff] }
  0x22   : > { %448 = vmatprep.mubr.f32.mxu0 %v1415_v0  ;;  %544 = vmatprep.mubr.f32.mxu1 %v1415_v0  ;;  %v260_v24 = vld [vmem:[%s1502_s4 + $0xd0] sm:$0xff]  ;;  %v261_v26 = vld [vmem:[%s1502_s4 + $0xd8] sm:$0xff]  ;;  %v246_v27 = vld [vmem:[%s1502_s4 + $0x60] sm:$0xff] }
  0x23   : > { %v262_v28 = vld [vmem:[%s1502_s4 + $0xe0] sm:$0xff]  ;;  %v247_v29 = vld [vmem:[%s1502_s4 + $0x68] sm:$0xff]  ;;  %v248_v31 = vld [vmem:[%s1502_s4 + $0x70] sm:$0xff] }
  0x24   : > { %v263_v30 = vld [vmem:[%s1502_s4 + $0xe8] sm:$0xff]  ;;  %v264_v32 = vld [vmem:[%s1502_s4 + $0xf0] sm:$0xff]  ;;  %v249_v33 = vld [vmem:[%s1502_s4 + $0x78] sm:$0xff] }
  0x25   : > { %1200 = vmatmul.mubr.msk.f32.gmra.mxu0 %vm268_vm1, %v236_v7  ;;  %1216 = vmatmul.mubr.msk.f32.gmra.mxu1 %vm268_vm1, %v252_v8  ;;  %v265_v34 = vld [vmem:[%s1502_s4 + $0xf8] sm:$0xff]  ;;  %s1019_s4 = scalar_lea.sflag [#allocation3], %s1604_s8 }
  0x26   : > { %454 = vmatprep.mubr.f32.mxu0 %v1415_v0  ;;  %550 = vmatprep.mubr.f32.mxu1 %v1415_v0 }
  0x29   : > { %1201 = vmatmul.mubr.msk.f32.gmra.mxu0 %vm268_vm1, %v237_v9  ;;  %1217 = vmatmul.mubr.msk.f32.gmra.mxu1 %vm268_vm1, %v253_v10 }
  0x2a   : > { %460 = vmatprep.mubr.f32.mxu0 %v1415_v0  ;;  %556 = vmatprep.mubr.f32.mxu1 %v1415_v0 }
  0x2d   : > { %1202 = vmatmul.mubr.msk.f32.gmra.mxu0 %vm268_vm1, %v238_v11  ;;  %1218 = vmatmul.mubr.msk.f32.gmra.mxu1 %vm268_vm1, %v254_v12 }
  0x2e   : > { %466 = vmatprep.mubr.f32.mxu0 %v1415_v0  ;;  %562 = vmatprep.mubr.f32.mxu1 %v1415_v0 }
  0x31   : > { %1203 = vmatmul.mubr.msk.f32.gmra.mxu0 %vm268_vm1, %v239_v13  ;;  %1219 = vmatmul.mubr.msk.f32.gmra.mxu1 %vm268_vm1, %v255_v14 }
  0x32   : > { %472 = vmatprep.mubr.f32.mxu0 %v1415_v0  ;;  %568 = vmatprep.mubr.f32.mxu1 %v1415_v0 }
  0x35   : > { %1204 = vmatmul.mubr.msk.f32.gmra.mxu0 %vm268_vm1, %v240_v15  ;;  %1220 = vmatmul.mubr.msk.f32.gmra.mxu1 %vm268_vm1, %v256_v16 }
  0x36   : > { %478 = vmatprep.mubr.f32.mxu0 %v1415_v0  ;;  %574 = vmatprep.mubr.f32.mxu1 %v1415_v0 }
  0x39   : > { %1205 = vmatmul.mubr.msk.f32.gmra.mxu0 %vm268_vm1, %v241_v17  ;;  %1221 = vmatmul.mubr.msk.f32.gmra.mxu1 %vm268_vm1, %v257_v18 }
  0x3a   : > { %484 = vmatprep.mubr.f32.mxu0 %v1415_v0  ;;  %580 = vmatprep.mubr.f32.mxu1 %v1415_v0 }
  0x3d   : > { %1206 = vmatmul.mubr.msk.f32.gmra.mxu0 %vm268_vm1, %v242_v19  ;;  %1222 = vmatmul.mubr.msk.f32.gmra.mxu1 %vm268_vm1, %v258_v20 }
  0x3e   : > { %490 = vmatprep.mubr.f32.mxu0 %v1415_v0  ;;  %586 = vmatprep.mubr.f32.mxu1 %v1415_v0 }
  0x41   : > { %1207 = vmatmul.mubr.msk.f32.gmra.mxu0 %vm268_vm1, %v243_v21  ;;  %1223 = vmatmul.mubr.msk.f32.gmra.mxu1 %vm268_vm1, %v259_v22 }
  0x42   : > { %496 = vmatprep.mubr.f32.mxu0 %v1415_v0  ;;  %592 = vmatprep.mubr.f32.mxu1 %v1415_v0 }
  0x45   : > { %1208 = vmatmul.mubr.msk.f32.gmra.mxu0 %vm268_vm1, %v244_v23  ;;  %1224 = vmatmul.mubr.msk.f32.gmra.mxu1 %vm268_vm1, %v260_v24 }
  0x46   : > { %502 = vmatprep.mubr.f32.mxu0 %v1415_v0  ;;  %598 = vmatprep.mubr.f32.mxu1 %v1415_v0 }
  0x49   : > { %1209 = vmatmul.mubr.msk.f32.gmra.mxu0 %vm268_vm1, %v245_v25  ;;  %1225 = vmatmul.mubr.msk.f32.gmra.mxu1 %vm268_vm1, %v261_v26 }
  0x4a   : > { %508 = vmatprep.mubr.f32.mxu0 %v1415_v0  ;;  %604 = vmatprep.mubr.f32.mxu1 %v1415_v0 }
  0x4d   : > { %1210 = vmatmul.mubr.msk.f32.gmra.mxu0 %vm268_vm1, %v246_v27  ;;  %1226 = vmatmul.mubr.msk.f32.gmra.mxu1 %vm268_vm1, %v262_v28 }
  0x4e   : > { %514 = vmatprep.mubr.f32.mxu0 %v1415_v0  ;;  %610 = vmatprep.mubr.f32.mxu1 %v1415_v0 }
  0x51   : > { %1211 = vmatmul.mubr.msk.f32.gmra.mxu0 %vm268_vm1, %v247_v29  ;;  %1227 = vmatmul.mubr.msk.f32.gmra.mxu1 %vm268_vm1, %v263_v30 }
  0x52   : > { %520 = vmatprep.mubr.f32.mxu0 %v1415_v0  ;;  %616 = vmatprep.mubr.f32.mxu1 %v1415_v0 }
  0x55   : > { %1212 = vmatmul.mubr.msk.f32.gmra.mxu0 %vm268_vm1, %v248_v31  ;;  %1228 = vmatmul.mubr.msk.f32.gmra.mxu1 %vm268_vm1, %v264_v32 }
  0x56   : > { %526 = vmatprep.mubr.f32.mxu0 %v1415_v0  ;;  %622 = vmatprep.mubr.f32.mxu1 %v1415_v0 }
  0x59   : > { %1213 = vmatmul.mubr.msk.f32.gmra.mxu0 %vm268_vm1, %v249_v33  ;;  %1229 = vmatmul.mubr.msk.f32.gmra.mxu1 %vm268_vm1, %v265_v34 }
  0xdd   : > { %v438_v39 = vpop.f32.mrf.mxu0  ;;  %v534_v40 = vpop.f32.mrf.mxu1 }
  0xde   : > { %vm632_vm2 = vcmp.le.f32.partialorder %v438_v39, 1.0  ;;  %vm826_vm3 = vcmp.le.f32.partialorder %v438_v39, 4.0  ;;  %vm664_vm4 = vcmp.le.f32.partialorder %v534_v40, 1.0  ;;  %vm858_vm5 = vcmp.le.f32.partialorder %v534_v40, 4.0 }
  0xdf   : > { %v698_v42 = vsel %vm632_vm2, %v1601_v38, 4294967040  ;;  %v890_v43 = vsel %vm826_vm3, %v1601_v38, 4294967040  ;;  %v730_v44 = vsel %vm664_vm4, %v1601_v38, 4294967040  ;;  %v922_v45 = vsel %vm858_vm5, %v1601_v38, 4294967040  ;;  %v440_v46 = vpop.f32.mrf.mxu0  ;;  %v536_v47 = vpop.f32.mrf.mxu1 }
  0xe0   : > { %vm633_vm6 = vcmp.le.f32.partialorder %v440_v46, 1.0  ;;  %vm827_vm7 = vcmp.le.f32.partialorder %v440_v46, 4.0  ;;  %vm665_vm8 = vcmp.le.f32.partialorder %v536_v47, 1.0  ;;  %vm859_vm9 = vcmp.le.f32.partialorder %v536_v47, 4.0 }
  0xe1   : > { %v699_v48 = vsel %vm633_vm6, %v1606_v41, 4294967040  ;;  %v891_v49 = vsel %vm827_vm7, %v1606_v41, 4294967040  ;;  %v731_v50 = vsel %vm665_vm8, %v1606_v41, 4294967040  ;;  %v923_v51 = vsel %vm859_vm9, %v1606_v41, 4294967040  ;;  %v444_v52 = vpop.f32.mrf.mxu0  ;;  %v540_v53 = vpop.f32.mrf.mxu1 }
  0xe2   : > { %v762_v54 = vpack.c.b16 %v699_v48, %v698_v42  ;;  %v954_v55 = vpack.c.b16 %v891_v49, %v890_v43  ;;  %v778_v56 = vpack.c.b16 %v731_v50, %v730_v44  ;;  %v970_v57 = vpack.c.b16 %v923_v51, %v922_v45 }
  0xe3   : > { %vm634_vm10 = vcmp.le.f32.partialorder %v444_v52, 1.0  ;;  %vm828_vm11 = vcmp.le.f32.partialorder %v444_v52, 4.0  ;;  %vm666_vm12 = vcmp.le.f32.partialorder %v540_v53, 1.0  ;;  %vm860_vm13 = vcmp.le.f32.partialorder %v540_v53, 4.0  ;;  %v446_v58 = vpop.f32.mrf.mxu0  ;;  %v542_v59 = vpop.f32.mrf.mxu1 }
  0xe4   : > { %794 = vst [vmem:[%s1617_s10] sm:$0xff] %v762_v54  ;;  %986 = vst [vmem:[%s1620_s11] sm:$0xff] %v954_v55  ;;  %v700_v60 = vsel %vm634_vm10, %v1601_v38, 4294967040  ;;  %v892_v61 = vsel %vm828_vm11, %v1601_v38, 4294967040  ;;  %v732_v62 = vsel %vm666_vm12, %v1601_v38, 4294967040  ;;  %v924_v63 = vsel %vm860_vm13, %v1601_v38, 4294967040 }
  0xe5   : > { %810 = vst [vmem:[%s1617_s10 + $0x80] sm:$0xff] %v778_v56  ;;  %1002 = vst [vmem:[%s1620_s11 + $0x80] sm:$0xff] %v970_v57  ;;  %vm635_vm14 = vcmp.le.f32.partialorder %v446_v58, 1.0  ;;  %vm829_vm15 = vcmp.le.f32.partialorder %v446_v58, 4.0  ;;  %vm667_vm0 = vcmp.le.f32.partialorder %v542_v59, 1.0  ;;  %vm861_vm1 = vcmp.le.f32.partialorder %v542_v59, 4.0  ;;  %v450_v0 = vpop.f32.mrf.mxu0  ;;  %v546_v1 = vpop.f32.mrf.mxu1 }
  0xe6   : > { %v701_v2 = vsel %vm635_vm14, %v1606_v41, 4294967040  ;;  %v893_v3 = vsel %vm829_vm15, %v1606_v41, 4294967040  ;;  %v733_v4 = vsel %vm667_vm0, %v1606_v41, 4294967040  ;;  %v925_v5 = vsel %vm861_vm1, %v1606_v41, 4294967040 }
  0xe7   : > { %v763_v6 = vpack.c.b16 %v701_v2, %v700_v60  ;;  %v955_v7 = vpack.c.b16 %v893_v3, %v892_v61  ;;  %v779_v8 = vpack.c.b16 %v733_v4, %v732_v62  ;;  %v971_v9 = vpack.c.b16 %v925_v5, %v924_v63  ;;  %v452_v10 = vpop.f32.mrf.mxu0  ;;  %v548_v11 = vpop.f32.mrf.mxu1 }
  0xe8   : > { %vm636_vm2 = vcmp.le.f32.partialorder %v450_v0, 1.0  ;;  %vm830_vm3 = vcmp.le.f32.partialorder %v450_v0, 4.0  ;;  %vm668_vm4 = vcmp.le.f32.partialorder %v546_v1, 1.0  ;;  %vm862_vm5 = vcmp.le.f32.partialorder %v546_v1, 4.0 }
  0xe9   : > { %795 = vst [vmem:[%s1617_s10 + $0x8] sm:$0xff] %v763_v6  ;;  %987 = vst [vmem:[%s1620_s11 + $0x8] sm:$0xff] %v955_v7  ;;  %v702_v12 = vsel %vm636_vm2, %v1601_v38, 4294967040  ;;  %v894_v13 = vsel %vm830_vm3, %v1601_v38, 4294967040  ;;  %v734_v14 = vsel %vm668_vm4, %v1601_v38, 4294967040  ;;  %v926_v15 = vsel %vm862_vm5, %v1601_v38, 4294967040  ;;  %v456_v16 = vpop.f32.mrf.mxu0  ;;  %v552_v17 = vpop.f32.mrf.mxu1 }
  0xea   : > { %811 = vst [vmem:[%s1617_s10 + $0x88] sm:$0xff] %v779_v8  ;;  %1003 = vst [vmem:[%s1620_s11 + $0x88] sm:$0xff] %v971_v9  ;;  %vm637_vm6 = vcmp.le.f32.partialorder %v452_v10, 1.0  ;;  %vm831_vm7 = vcmp.le.f32.partialorder %v452_v10, 4.0  ;;  %vm669_vm8 = vcmp.le.f32.partialorder %v548_v11, 1.0  ;;  %vm863_vm9 = vcmp.le.f32.partialorder %v548_v11, 4.0 }
  0xeb   : > { %v703_v18 = vsel %vm637_vm6, %v1606_v41, 4294967040  ;;  %v895_v19 = vsel %vm831_vm7, %v1606_v41, 4294967040  ;;  %v735_v20 = vsel %vm669_vm8, %v1606_v41, 4294967040  ;;  %v927_v21 = vsel %vm863_vm9, %v1606_v41, 4294967040  ;;  %v458_v22 = vpop.f32.mrf.mxu0  ;;  %v554_v23 = vpop.f32.mrf.mxu1 }
  0xec   : > { %v764_v24 = vpack.c.b16 %v703_v18, %v702_v12  ;;  %v956_v25 = vpack.c.b16 %v895_v19, %v894_v13  ;;  %v780_v26 = vpack.c.b16 %v735_v20, %v734_v14  ;;  %v972_v27 = vpack.c.b16 %v927_v21, %v926_v15 }
  0xed   : > { %vm638_vm10 = vcmp.le.f32.partialorder %v456_v16, 1.0  ;;  %vm832_vm11 = vcmp.le.f32.partialorder %v456_v16, 4.0  ;;  %vm670_vm12 = vcmp.le.f32.partialorder %v552_v17, 1.0  ;;  %vm864_vm13 = vcmp.le.f32.partialorder %v552_v17, 4.0  ;;  %v462_v28 = vpop.f32.mrf.mxu0  ;;  %v558_v29 = vpop.f32.mrf.mxu1 }
  0xee   : > { %796 = vst [vmem:[%s1617_s10 + $0x10] sm:$0xff] %v764_v24  ;;  %988 = vst [vmem:[%s1620_s11 + $0x10] sm:$0xff] %v956_v25  ;;  %v704_v30 = vsel %vm638_vm10, %v1601_v38, 4294967040  ;;  %v896_v31 = vsel %vm832_vm11, %v1601_v38, 4294967040  ;;  %v736_v32 = vsel %vm670_vm12, %v1601_v38, 4294967040  ;;  %v928_v33 = vsel %vm864_vm13, %v1601_v38, 4294967040 }
  0xef   : > { %812 = vst [vmem:[%s1617_s10 + $0x90] sm:$0xff] %v780_v26  ;;  %1004 = vst [vmem:[%s1620_s11 + $0x90] sm:$0xff] %v972_v27  ;;  %vm639_vm14 = vcmp.le.f32.partialorder %v458_v22, 1.0  ;;  %vm833_vm15 = vcmp.le.f32.partialorder %v458_v22, 4.0  ;;  %vm671_vm0 = vcmp.le.f32.partialorder %v554_v23, 1.0  ;;  %vm865_vm1 = vcmp.le.f32.partialorder %v554_v23, 4.0  ;;  %v464_v34 = vpop.f32.mrf.mxu0  ;;  %v560_v35 = vpop.f32.mrf.mxu1 }
  0xf0   : > { %v705_v36 = vsel %vm639_vm14, %v1606_v41, 4294967040  ;;  %v897_v37 = vsel %vm833_vm15, %v1606_v41, 4294967040  ;;  %v737_v39 = vsel %vm671_vm0, %v1606_v41, 4294967040  ;;  %v929_v40 = vsel %vm865_vm1, %v1606_v41, 4294967040 }
  0xf1   : > { %v765_v42 = vpack.c.b16 %v705_v36, %v704_v30  ;;  %v957_v43 = vpack.c.b16 %v897_v37, %v896_v31  ;;  %v781_v44 = vpack.c.b16 %v737_v39, %v736_v32  ;;  %v973_v45 = vpack.c.b16 %v929_v40, %v928_v33  ;;  %v468_v46 = vpop.f32.mrf.mxu0  ;;  %v564_v47 = vpop.f32.mrf.mxu1 }
  0xf2   : > { %vm640_vm2 = vcmp.le.f32.partialorder %v462_v28, 1.0  ;;  %vm834_vm3 = vcmp.le.f32.partialorder %v462_v28, 4.0  ;;  %vm672_vm4 = vcmp.le.f32.partialorder %v558_v29, 1.0  ;;  %vm866_vm5 = vcmp.le.f32.partialorder %v558_v29, 4.0 }
  0xf3   : > { %797 = vst [vmem:[%s1617_s10 + $0x18] sm:$0xff] %v765_v42  ;;  %989 = vst [vmem:[%s1620_s11 + $0x18] sm:$0xff] %v957_v43  ;;  %v706_v48 = vsel %vm640_vm2, %v1601_v38, 4294967040  ;;  %v898_v49 = vsel %vm834_vm3, %v1601_v38, 4294967040  ;;  %v738_v50 = vsel %vm672_vm4, %v1601_v38, 4294967040  ;;  %v930_v51 = vsel %vm866_vm5, %v1601_v38, 4294967040  ;;  %v470_v52 = vpop.f32.mrf.mxu0  ;;  %v566_v53 = vpop.f32.mrf.mxu1 }
  0xf4   : > { %813 = vst [vmem:[%s1617_s10 + $0x98] sm:$0xff] %v781_v44  ;;  %1005 = vst [vmem:[%s1620_s11 + $0x98] sm:$0xff] %v973_v45  ;;  %vm641_vm6 = vcmp.le.f32.partialorder %v464_v34, 1.0  ;;  %vm835_vm7 = vcmp.le.f32.partialorder %v464_v34, 4.0  ;;  %vm673_vm8 = vcmp.le.f32.partialorder %v560_v35, 1.0  ;;  %vm867_vm9 = vcmp.le.f32.partialorder %v560_v35, 4.0 }
  0xf5   : > { %v707_v54 = vsel %vm641_vm6, %v1606_v41, 4294967040  ;;  %v899_v55 = vsel %vm835_vm7, %v1606_v41, 4294967040  ;;  %v739_v56 = vsel %vm673_vm8, %v1606_v41, 4294967040  ;;  %v931_v57 = vsel %vm867_vm9, %v1606_v41, 4294967040  ;;  %v474_v58 = vpop.f32.mrf.mxu0  ;;  %v570_v59 = vpop.f32.mrf.mxu1 }
  0xf6   : > { %v766_v60 = vpack.c.b16 %v707_v54, %v706_v48  ;;  %v958_v61 = vpack.c.b16 %v899_v55, %v898_v49  ;;  %v782_v62 = vpack.c.b16 %v739_v56, %v738_v50  ;;  %v974_v63 = vpack.c.b16 %v931_v57, %v930_v51 }
  0xf7   : > { %vm642_vm10 = vcmp.le.f32.partialorder %v468_v46, 1.0  ;;  %vm836_vm11 = vcmp.le.f32.partialorder %v468_v46, 4.0  ;;  %vm674_vm12 = vcmp.le.f32.partialorder %v564_v47, 1.0  ;;  %vm868_vm13 = vcmp.le.f32.partialorder %v564_v47, 4.0  ;;  %v476_v0 = vpop.f32.mrf.mxu0  ;;  %v572_v1 = vpop.f32.mrf.mxu1 }
  0xf8   : > { %798 = vst [vmem:[%s1617_s10 + $0x20] sm:$0xff] %v766_v60  ;;  %990 = vst [vmem:[%s1620_s11 + $0x20] sm:$0xff] %v958_v61  ;;  %v708_v2 = vsel %vm642_vm10, %v1601_v38, 4294967040  ;;  %v900_v3 = vsel %vm836_vm11, %v1601_v38, 4294967040  ;;  %v740_v4 = vsel %vm674_vm12, %v1601_v38, 4294967040  ;;  %v932_v5 = vsel %vm868_vm13, %v1601_v38, 4294967040 }
  0xf9   : > { %814 = vst [vmem:[%s1617_s10 + $0xa0] sm:$0xff] %v782_v62  ;;  %1006 = vst [vmem:[%s1620_s11 + $0xa0] sm:$0xff] %v974_v63  ;;  %vm643_vm14 = vcmp.le.f32.partialorder %v470_v52, 1.0  ;;  %vm837_vm15 = vcmp.le.f32.partialorder %v470_v52, 4.0  ;;  %vm675_vm0 = vcmp.le.f32.partialorder %v566_v53, 1.0  ;;  %vm869_vm1 = vcmp.le.f32.partialorder %v566_v53, 4.0  ;;  %v480_v6 = vpop.f32.mrf.mxu0  ;;  %v576_v7 = vpop.f32.mrf.mxu1 }
  0xfa   : > { %v709_v8 = vsel %vm643_vm14, %v1606_v41, 4294967040  ;;  %v901_v9 = vsel %vm837_vm15, %v1606_v41, 4294967040  ;;  %v741_v10 = vsel %vm675_vm0, %v1606_v41, 4294967040  ;;  %v933_v11 = vsel %vm869_vm1, %v1606_v41, 4294967040 }
  0xfb   : > { %v767_v12 = vpack.c.b16 %v709_v8, %v708_v2  ;;  %v959_v13 = vpack.c.b16 %v901_v9, %v900_v3  ;;  %v783_v14 = vpack.c.b16 %v741_v10, %v740_v4  ;;  %v975_v15 = vpack.c.b16 %v933_v11, %v932_v5  ;;  %v482_v16 = vpop.f32.mrf.mxu0  ;;  %v578_v17 = vpop.f32.mrf.mxu1 }
  0xfc   : > { %vm644_vm2 = vcmp.le.f32.partialorder %v474_v58, 1.0  ;;  %vm838_vm3 = vcmp.le.f32.partialorder %v474_v58, 4.0  ;;  %vm676_vm4 = vcmp.le.f32.partialorder %v570_v59, 1.0  ;;  %vm870_vm5 = vcmp.le.f32.partialorder %v570_v59, 4.0 }
  0xfd   : > { %799 = vst [vmem:[%s1617_s10 + $0x28] sm:$0xff] %v767_v12  ;;  %991 = vst [vmem:[%s1620_s11 + $0x28] sm:$0xff] %v959_v13  ;;  %v710_v18 = vsel %vm644_vm2, %v1601_v38, 4294967040  ;;  %v902_v19 = vsel %vm838_vm3, %v1601_v38, 4294967040  ;;  %v742_v20 = vsel %vm676_vm4, %v1601_v38, 4294967040  ;;  %v934_v21 = vsel %vm870_vm5, %v1601_v38, 4294967040  ;;  %v486_v22 = vpop.f32.mrf.mxu0  ;;  %v582_v23 = vpop.f32.mrf.mxu1 }
  0xfe   : > { %815 = vst [vmem:[%s1617_s10 + $0xa8] sm:$0xff] %v783_v14  ;;  %1007 = vst [vmem:[%s1620_s11 + $0xa8] sm:$0xff] %v975_v15  ;;  %vm645_vm6 = vcmp.le.f32.partialorder %v476_v0, 1.0  ;;  %vm839_vm7 = vcmp.le.f32.partialorder %v476_v0, 4.0  ;;  %vm677_vm8 = vcmp.le.f32.partialorder %v572_v1, 1.0  ;;  %vm871_vm9 = vcmp.le.f32.partialorder %v572_v1, 4.0 }
  0xff   : > { %v711_v24 = vsel %vm645_vm6, %v1606_v41, 4294967040  ;;  %v903_v25 = vsel %vm839_vm7, %v1606_v41, 4294967040  ;;  %v743_v26 = vsel %vm677_vm8, %v1606_v41, 4294967040  ;;  %v935_v27 = vsel %vm871_vm9, %v1606_v41, 4294967040  ;;  %v488_v28 = vpop.f32.mrf.mxu0  ;;  %v584_v29 = vpop.f32.mrf.mxu1 }
 0x100   : > { %v768_v30 = vpack.c.b16 %v711_v24, %v710_v18  ;;  %v960_v31 = vpack.c.b16 %v903_v25, %v902_v19  ;;  %v784_v32 = vpack.c.b16 %v743_v26, %v742_v20  ;;  %v976_v33 = vpack.c.b16 %v935_v27, %v934_v21 }
 0x101   : > { %vm646_vm10 = vcmp.le.f32.partialorder %v480_v6, 1.0  ;;  %vm840_vm11 = vcmp.le.f32.partialorder %v480_v6, 4.0  ;;  %vm678_vm12 = vcmp.le.f32.partialorder %v576_v7, 1.0  ;;  %vm872_vm13 = vcmp.le.f32.partialorder %v576_v7, 4.0  ;;  %v1693_v34 = vpop.f32.mrf.mxu0  ;;  %v1695_v35 = vpop.f32.mrf.mxu1 }
 0x102   : > { %800 = vst [vmem:[%s1617_s10 + $0x30] sm:$0xff] %v768_v30  ;;  %992 = vst [vmem:[%s1620_s11 + $0x30] sm:$0xff] %v960_v31  ;;  %v712_v36 = vsel %vm646_vm10, %v1601_v38, 4294967040  ;;  %v904_v37 = vsel %vm840_vm11, %v1601_v38, 4294967040  ;;  %v744_v39 = vsel %vm678_vm12, %v1601_v38, 4294967040  ;;  %v936_v40 = vsel %vm872_vm13, %v1601_v38, 4294967040 }
 0x103   : > { %816 = vst [vmem:[%s1617_s10 + $0xb0] sm:$0xff] %v784_v32  ;;  %1008 = vst [vmem:[%s1620_s11 + $0xb0] sm:$0xff] %v976_v33  ;;  %vm647_vm14 = vcmp.le.f32.partialorder %v482_v16, 1.0  ;;  %vm841_vm15 = vcmp.le.f32.partialorder %v482_v16, 4.0  ;;  %vm679_vm0 = vcmp.le.f32.partialorder %v578_v17, 1.0  ;;  %vm873_vm1 = vcmp.le.f32.partialorder %v578_v17, 4.0  ;;  %v494_v42 = vpop.f32.mrf.mxu0  ;;  %v1705_v43 = vpop.f32.mrf.mxu1 }
 0x104   : > { %v713_v44 = vsel %vm647_vm14, %v1606_v41, 4294967040  ;;  %v905_v45 = vsel %vm841_vm15, %v1606_v41, 4294967040  ;;  %v745_v46 = vsel %vm679_vm0, %v1606_v41, 4294967040  ;;  %v937_v47 = vsel %vm873_vm1, %v1606_v41, 4294967040 }
 0x105   : > { %v769_v48 = vpack.c.b16 %v713_v44, %v712_v36  ;;  %v961_v49 = vpack.c.b16 %v905_v45, %v904_v37  ;;  %v785_v50 = vpack.c.b16 %v745_v46, %v744_v39  ;;  %v977_v51 = vpack.c.b16 %v937_v47, %v936_v40  ;;  %v1711_v52 = vpop.f32.mrf.mxu0  ;;  %v1713_v53 = vpop.f32.mrf.mxu1 }
 0x106   : > { %vm648_vm2 = vcmp.le.f32.partialorder %v486_v22, 1.0  ;;  %vm842_vm3 = vcmp.le.f32.partialorder %v486_v22, 4.0  ;;  %vm680_vm4 = vcmp.le.f32.partialorder %v582_v23, 1.0  ;;  %vm874_vm5 = vcmp.le.f32.partialorder %v582_v23, 4.0 }
 0x107   : > { %801 = vst [vmem:[%s1617_s10 + $0x38] sm:$0xff] %v769_v48  ;;  %993 = vst [vmem:[%s1620_s11 + $0x38] sm:$0xff] %v961_v49  ;;  %v714_v54 = vsel %vm648_vm2, %v1601_v38, 4294967040  ;;  %v906_v55 = vsel %vm842_vm3, %v1601_v38, 4294967040  ;;  %v746_v56 = vsel %vm680_vm4, %v1601_v38, 4294967040  ;;  %v938_v57 = vsel %vm874_vm5, %v1601_v38, 4294967040  ;;  %v1723_v58 = vpop.f32.mrf.mxu0  ;;  %v1725_v59 = vpop.f32.mrf.mxu1 }
 0x108   : > { %817 = vst [vmem:[%s1617_s10 + $0xb8] sm:$0xff] %v785_v50  ;;  %1009 = vst [vmem:[%s1620_s11 + $0xb8] sm:$0xff] %v977_v51  ;;  %vm649_vm6 = vcmp.le.f32.partialorder %v488_v28, 1.0  ;;  %vm843_vm7 = vcmp.le.f32.partialorder %v488_v28, 4.0  ;;  %vm681_vm8 = vcmp.le.f32.partialorder %v584_v29, 1.0  ;;  %vm875_vm9 = vcmp.le.f32.partialorder %v584_v29, 4.0 }
 0x109   : > { %v715_v60 = vsel %vm649_vm6, %v1606_v41, 4294967040  ;;  %v907_v61 = vsel %vm843_vm7, %v1606_v41, 4294967040  ;;  %v747_v62 = vsel %vm681_vm8, %v1606_v41, 4294967040  ;;  %v939_v63 = vsel %vm875_vm9, %v1606_v41, 4294967040  ;;  %v1731_v0 = vpop.f32.mrf.mxu0  ;;  %v1733_v1 = vpop.f32.mrf.mxu1 }
 0x10a   : > { %v770_v2 = vpack.c.b16 %v715_v60, %v714_v54  ;;  %v962_v3 = vpack.c.b16 %v907_v61, %v906_v55  ;;  %v786_v4 = vpack.c.b16 %v747_v62, %v746_v56  ;;  %v978_v5 = vpack.c.b16 %v939_v63, %v938_v57 }
 0x10b   : > { %vm650_vm10 = vcmp.le.f32.partialorder %v1693_v34, 1.0  ;;  %vm844_vm11 = vcmp.le.f32.partialorder %v1693_v34, 4.0  ;;  %vm682_vm12 = vcmp.le.f32.partialorder %v1695_v35, 1.0  ;;  %vm876_vm13 = vcmp.le.f32.partialorder %v1695_v35, 4.0  ;;  %v1739_v6 = vpop.f32.mrf.mxu0  ;;  %v1741_v7 = vpop.f32.mrf.mxu1 }
 0x10c   : > { %802 = vst [vmem:[%s1617_s10 + $0x40] sm:$0xff] %v770_v2  ;;  %994 = vst [vmem:[%s1620_s11 + $0x40] sm:$0xff] %v962_v3  ;;  %v716_v8 = vsel %vm650_vm10, %v1601_v38, 4294967040  ;;  %v908_v9 = vsel %vm844_vm11, %v1601_v38, 4294967040  ;;  %v748_v10 = vsel %vm682_vm12, %v1601_v38, 4294967040  ;;  %v940_v11 = vsel %vm876_vm13, %v1601_v38, 4294967040 }
 0x10d   : > { %818 = vst [vmem:[%s1617_s10 + $0xc0] sm:$0xff] %v786_v4  ;;  %1010 = vst [vmem:[%s1620_s11 + $0xc0] sm:$0xff] %v978_v5  ;;  %vm651_vm14 = vcmp.le.f32.partialorder %v494_v42, 1.0  ;;  %vm845_vm15 = vcmp.le.f32.partialorder %v494_v42, 4.0  ;;  %vm683_vm0 = vcmp.le.f32.partialorder %v1705_v43, 1.0  ;;  %vm877_vm1 = vcmp.le.f32.partialorder %v1705_v43, 4.0  ;;  %v1753_v12 = vpop.f32.mrf.mxu0  ;;  %v1755_v13 = vpop.f32.mrf.mxu1 }
 0x10e   : > { %v717_v14 = vsel %vm651_vm14, %v1606_v41, 4294967040  ;;  %v909_v15 = vsel %vm845_vm15, %v1606_v41, 4294967040  ;;  %v749_v16 = vsel %vm683_vm0, %v1606_v41, 4294967040  ;;  %v941_v17 = vsel %vm877_vm1, %v1606_v41, 4294967040 }
 0x10f   : > { %v771_v18 = vpack.c.b16 %v717_v14, %v716_v8  ;;  %v963_v19 = vpack.c.b16 %v909_v15, %v908_v9  ;;  %v787_v20 = vpack.c.b16 %v749_v16, %v748_v10  ;;  %v979_v21 = vpack.c.b16 %v941_v17, %v940_v11  ;;  %v1765_v22 = vpop.f32.mrf.mxu0  ;;  %v1767_v23 = vpop.f32.mrf.mxu1 }
 0x110   : > { %vm652_vm2 = vcmp.le.f32.partialorder %v1711_v52, 1.0  ;;  %vm846_vm3 = vcmp.le.f32.partialorder %v1711_v52, 4.0  ;;  %vm684_vm4 = vcmp.le.f32.partialorder %v1713_v53, 1.0  ;;  %vm878_vm5 = vcmp.le.f32.partialorder %v1713_v53, 4.0 }
 0x111   : > { %803 = vst [vmem:[%s1617_s10 + $0x48] sm:$0xff] %v771_v18  ;;  %995 = vst [vmem:[%s1620_s11 + $0x48] sm:$0xff] %v963_v19  ;;  %v718_v24 = vsel %vm652_vm2, %v1601_v38, 4294967040  ;;  %v910_v25 = vsel %vm846_vm3, %v1601_v38, 4294967040  ;;  %v750_v26 = vsel %vm684_vm4, %v1601_v38, 4294967040  ;;  %v942_v27 = vsel %vm878_vm5, %v1601_v38, 4294967040  ;;  %v1785_v36 = vpop.f32.mrf.mxu0  ;;  %v1787_v37 = vpop.f32.mrf.mxu1 }
 0x112   : > { %819 = vst [vmem:[%s1617_s10 + $0xc8] sm:$0xff] %v787_v20  ;;  %1011 = vst [vmem:[%s1620_s11 + $0xc8] sm:$0xff] %v979_v21  ;;  %vm653_vm6 = vcmp.le.f32.partialorder %v1723_v58, 1.0  ;;  %vm847_vm7 = vcmp.le.f32.partialorder %v1723_v58, 4.0  ;;  %vm685_vm8 = vcmp.le.f32.partialorder %v1725_v59, 1.0  ;;  %vm879_vm9 = vcmp.le.f32.partialorder %v1725_v59, 4.0 }
 0x113   : > { %v719_v28 = vsel %vm653_vm6, %v1606_v41, 4294967040  ;;  %v911_v29 = vsel %vm847_vm7, %v1606_v41, 4294967040  ;;  %v751_v30 = vsel %vm685_vm8, %v1606_v41, 4294967040  ;;  %v943_v31 = vsel %vm879_vm9, %v1606_v41, 4294967040  ;;  %v518_v48 = vpop.f32.mrf.mxu0  ;;  %v614_v49 = vpop.f32.mrf.mxu1 }
 0x114   : > { %v772_v32 = vpack.c.b16 %v719_v28, %v718_v24  ;;  %v964_v33 = vpack.c.b16 %v911_v29, %v910_v25  ;;  %v788_v34 = vpack.c.b16 %v751_v30, %v750_v26  ;;  %v980_v35 = vpack.c.b16 %v943_v31, %v942_v27 }
 0x115   : > { %vm654_vm10 = vcmp.le.f32.partialorder %v1731_v0, 1.0  ;;  %vm848_vm11 = vcmp.le.f32.partialorder %v1731_v0, 4.0  ;;  %vm686_vm12 = vcmp.le.f32.partialorder %v1733_v1, 1.0  ;;  %vm880_vm13 = vcmp.le.f32.partialorder %v1733_v1, 4.0  ;;  %v522_v58 = vpop.f32.mrf.mxu0  ;;  %v618_v59 = vpop.f32.mrf.mxu1 }
 0x116   : > { %804 = vst [vmem:[%s1617_s10 + $0x50] sm:$0xff] %v772_v32  ;;  %996 = vst [vmem:[%s1620_s11 + $0x50] sm:$0xff] %v964_v33  ;;  %v720_v39 = vsel %vm654_vm10, %v1601_v38, 4294967040  ;;  %v912_v40 = vsel %vm848_vm11, %v1601_v38, 4294967040  ;;  %v752_v42 = vsel %vm686_vm12, %v1601_v38, 4294967040  ;;  %v944_v43 = vsel %vm880_vm13, %v1601_v38, 4294967040 }
 0x117   : > { %820 = vst [vmem:[%s1617_s10 + $0xd0] sm:$0xff] %v788_v34  ;;  %1012 = vst [vmem:[%s1620_s11 + $0xd0] sm:$0xff] %v980_v35  ;;  %vm655_vm14 = vcmp.le.f32.partialorder %v1739_v6, 1.0  ;;  %vm849_vm15 = vcmp.le.f32.partialorder %v1739_v6, 4.0  ;;  %vm687_vm0 = vcmp.le.f32.partialorder %v1741_v7, 1.0  ;;  %vm881_vm1 = vcmp.le.f32.partialorder %v1741_v7, 4.0  ;;  %v524_v8 = vpop.f32.mrf.mxu0  ;;  %v620_v9 = vpop.f32.mrf.mxu1 }
 0x118   : > { %v721_v44 = vsel %vm655_vm14, %v1606_v41, 4294967040  ;;  %v913_v45 = vsel %vm849_vm15, %v1606_v41, 4294967040  ;;  %v753_v46 = vsel %vm687_vm0, %v1606_v41, 4294967040  ;;  %v945_v47 = vsel %vm881_vm1, %v1606_v41, 4294967040 }
 0x119   : > { %v773_v50 = vpack.c.b16 %v721_v44, %v720_v39  ;;  %v965_v51 = vpack.c.b16 %v913_v45, %v912_v40  ;;  %v789_v52 = vpack.c.b16 %v753_v46, %v752_v42  ;;  %v981_v53 = vpack.c.b16 %v945_v47, %v944_v43  ;;  %v528_v18 = vpop.f32.mrf.mxu0  ;;  %v624_v19 = vpop.f32.mrf.mxu1 }
 0x11a   : > { %vm656_vm2 = vcmp.le.f32.partialorder %v1753_v12, 1.0  ;;  %vm850_vm3 = vcmp.le.f32.partialorder %v1753_v12, 4.0  ;;  %vm688_vm4 = vcmp.le.f32.partialorder %v1755_v13, 1.0  ;;  %vm882_vm5 = vcmp.le.f32.partialorder %v1755_v13, 4.0 }
 0x11b   : > { %805 = vst [vmem:[%s1617_s10 + $0x58] sm:$0xff] %v773_v50  ;;  %997 = vst [vmem:[%s1620_s11 + $0x58] sm:$0xff] %v965_v51  ;;  %v722_v54 = vsel %vm656_vm2, %v1601_v38, 4294967040  ;;  %v914_v55 = vsel %vm850_vm3, %v1601_v38, 4294967040  ;;  %v754_v56 = vsel %vm688_vm4, %v1601_v38, 4294967040  ;;  %v946_v57 = vsel %vm882_vm5, %v1601_v38, 4294967040  ;;  %v530_v32 = vpop.f32.mrf.mxu0  ;;  %v626_v33 = vpop.f32.mrf.mxu1 }
 0x11c   : > { %821 = vst [vmem:[%s1617_s10 + $0xd8] sm:$0xff] %v789_v52  ;;  %1013 = vst [vmem:[%s1620_s11 + $0xd8] sm:$0xff] %v981_v53  ;;  %vm657_vm6 = vcmp.le.f32.partialorder %v1765_v22, 1.0  ;;  %vm851_vm7 = vcmp.le.f32.partialorder %v1765_v22, 4.0  ;;  %vm689_vm8 = vcmp.le.f32.partialorder %v1767_v23, 1.0  ;;  %vm883_vm9 = vcmp.le.f32.partialorder %v1767_v23, 4.0 }
 0x11d   : > { %v723_v60 = vsel %vm657_vm6, %v1606_v41, 4294967040  ;;  %v915_v61 = vsel %vm851_vm7, %v1606_v41, 4294967040  ;;  %v755_v62 = vsel %vm689_vm8, %v1606_v41, 4294967040  ;;  %v947_v63 = vsel %vm883_vm9, %v1606_v41, 4294967040 }
 0x11e   : > { %v774_v0 = vpack.c.b16 %v723_v60, %v722_v54  ;;  %v966_v1 = vpack.c.b16 %v915_v61, %v914_v55  ;;  %v790_v2 = vpack.c.b16 %v755_v62, %v754_v56  ;;  %v982_v3 = vpack.c.b16 %v947_v63, %v946_v57 }
 0x11f   : > { %vm658_vm10 = vcmp.le.f32.partialorder %v1785_v36, 1.0  ;;  %vm852_vm11 = vcmp.le.f32.partialorder %v1785_v36, 4.0  ;;  %vm690_vm12 = vcmp.le.f32.partialorder %v1787_v37, 1.0  ;;  %vm884_vm13 = vcmp.le.f32.partialorder %v1787_v37, 4.0 }
 0x120   : > { %806 = vst [vmem:[%s1617_s10 + $0x60] sm:$0xff] %v774_v0  ;;  %998 = vst [vmem:[%s1620_s11 + $0x60] sm:$0xff] %v966_v1  ;;  %v724_v4 = vsel %vm658_vm10, %v1601_v38, 4294967040  ;;  %v916_v5 = vsel %vm852_vm11, %v1601_v38, 4294967040  ;;  %v756_v6 = vsel %vm690_vm12, %v1601_v38, 4294967040  ;;  %v948_v7 = vsel %vm884_vm13, %v1601_v38, 4294967040 }
 0x121   : > { %822 = vst [vmem:[%s1617_s10 + $0xe0] sm:$0xff] %v790_v2  ;;  %1014 = vst [vmem:[%s1620_s11 + $0xe0] sm:$0xff] %v982_v3  ;;  %vm659_vm14 = vcmp.le.f32.partialorder %v518_v48, 1.0  ;;  %vm853_vm15 = vcmp.le.f32.partialorder %v518_v48, 4.0  ;;  %vm691_vm0 = vcmp.le.f32.partialorder %v614_v49, 1.0  ;;  %vm885_vm1 = vcmp.le.f32.partialorder %v614_v49, 4.0 }
 0x122   : > { %v725_v10 = vsel %vm659_vm14, %v1606_v41, 4294967040  ;;  %v917_v11 = vsel %vm853_vm15, %v1606_v41, 4294967040  ;;  %v757_v12 = vsel %vm691_vm0, %v1606_v41, 4294967040  ;;  %v949_v13 = vsel %vm885_vm1, %v1606_v41, 4294967040 }
 0x123   : > { %v775_v14 = vpack.c.b16 %v725_v10, %v724_v4  ;;  %v967_v15 = vpack.c.b16 %v917_v11, %v916_v5  ;;  %v791_v16 = vpack.c.b16 %v757_v12, %v756_v6  ;;  %v983_v17 = vpack.c.b16 %v949_v13, %v948_v7 }
 0x124   : > { %vm660_vm2 = vcmp.le.f32.partialorder %v522_v58, 1.0  ;;  %vm854_vm3 = vcmp.le.f32.partialorder %v522_v58, 4.0  ;;  %vm692_vm4 = vcmp.le.f32.partialorder %v618_v59, 1.0  ;;  %vm886_vm5 = vcmp.le.f32.partialorder %v618_v59, 4.0 }
 0x125   : > { %807 = vst [vmem:[%s1617_s10 + $0x68] sm:$0xff] %v775_v14  ;;  %999 = vst [vmem:[%s1620_s11 + $0x68] sm:$0xff] %v967_v15  ;;  %v726_v20 = vsel %vm660_vm2, %v1601_v38, 4294967040  ;;  %v918_v21 = vsel %vm854_vm3, %v1601_v38, 4294967040  ;;  %v758_v22 = vsel %vm692_vm4, %v1601_v38, 4294967040  ;;  %v950_v23 = vsel %vm886_vm5, %v1601_v38, 4294967040 }
 0x126   : > { %823 = vst [vmem:[%s1617_s10 + $0xe8] sm:$0xff] %v791_v16  ;;  %1015 = vst [vmem:[%s1620_s11 + $0xe8] sm:$0xff] %v983_v17  ;;  %vm661_vm6 = vcmp.le.f32.partialorder %v524_v8, 1.0  ;;  %vm855_vm7 = vcmp.le.f32.partialorder %v524_v8, 4.0  ;;  %vm693_vm8 = vcmp.le.f32.partialorder %v620_v9, 1.0  ;;  %vm887_vm9 = vcmp.le.f32.partialorder %v620_v9, 4.0 }
 0x127   : > { %v727_v24 = vsel %vm661_vm6, %v1606_v41, 4294967040  ;;  %v919_v25 = vsel %vm855_vm7, %v1606_v41, 4294967040  ;;  %v759_v26 = vsel %vm693_vm8, %v1606_v41, 4294967040  ;;  %v951_v27 = vsel %vm887_vm9, %v1606_v41, 4294967040 }
 0x128   : > { %v776_v28 = vpack.c.b16 %v727_v24, %v726_v20  ;;  %v968_v29 = vpack.c.b16 %v919_v25, %v918_v21  ;;  %v792_v30 = vpack.c.b16 %v759_v26, %v758_v22  ;;  %v984_v31 = vpack.c.b16 %v951_v27, %v950_v23 }
 0x129   : > { %vm662_vm10 = vcmp.le.f32.partialorder %v528_v18, 1.0  ;;  %vm856_vm11 = vcmp.le.f32.partialorder %v528_v18, 4.0  ;;  %vm694_vm12 = vcmp.le.f32.partialorder %v624_v19, 1.0  ;;  %vm888_vm13 = vcmp.le.f32.partialorder %v624_v19, 4.0 }
 0x12a   : > { %808 = vst [vmem:[%s1617_s10 + $0x70] sm:$0xff] %v776_v28  ;;  %1000 = vst [vmem:[%s1620_s11 + $0x70] sm:$0xff] %v968_v29  ;;  %v728_v34 = vsel %vm662_vm10, %v1601_v38, 4294967040  ;;  %v920_v35 = vsel %vm856_vm11, %v1601_v38, 4294967040  ;;  %v760_v36 = vsel %vm694_vm12, %v1601_v38, 4294967040  ;;  %v952_v37 = vsel %vm888_vm13, %v1601_v38, 4294967040 }
 0x12b   : > { %824 = vst [vmem:[%s1617_s10 + $0xf0] sm:$0xff] %v792_v30  ;;  %1016 = vst [vmem:[%s1620_s11 + $0xf0] sm:$0xff] %v984_v31  ;;  %vm663_vm14 = vcmp.le.f32.partialorder %v530_v32, 1.0  ;;  %vm857_vm15 = vcmp.le.f32.partialorder %v530_v32, 4.0  ;;  %vm695_vm0 = vcmp.le.f32.partialorder %v626_v33, 1.0  ;;  %vm889_vm1 = vcmp.le.f32.partialorder %v626_v33, 4.0 }
 0x12c   : > { %v729_v39 = vsel %vm663_vm14, %v1606_v41, 4294967040  ;;  %v921_v38 = vsel %vm857_vm15, %v1606_v41, 4294967040  ;;  %v761_v40 = vsel %vm695_vm0, %v1606_v41, 4294967040  ;;  %v953_v42 = vsel %vm889_vm1, %v1606_v41, 4294967040 }
 0x12d   : > { %v777_v43 = vpack.c.b16 %v729_v39, %v728_v34  ;;  %v969_v44 = vpack.c.b16 %v921_v38, %v920_v35  ;;  %v793_v45 = vpack.c.b16 %v761_v40, %v760_v36  ;;  %v985_v46 = vpack.c.b16 %v953_v42, %v952_v37 }
 0x12f   : > { %809 = vst [vmem:[%s1617_s10 + $0x78] sm:$0xff] %v777_v43  ;;  %1001 = vst [vmem:[%s1620_s11 + $0x78] sm:$0xff] %v969_v44 }
 0x130   : > { %825 = vst [vmem:[%s1617_s10 + $0xf8] sm:$0xff] %v793_v45  ;;  %1017 = vst [vmem:[%s1620_s11 + $0xf8] sm:$0xff] %v985_v46 }
 0x131   : > { %1320 = shalt.err (!%p1317_p5)
}
 0x132   : > { %s1321_s9 = scalar_lea.hbm %s1872_s26, 4096  ;;  %s1325_s18 = scalar_lea.hbm %s1968_s2, 8192 }
 0x133   : > { %p1322_p6 = scmp.ne.s32.totalorder %s1872_s26, %s1321_s9  ;;  %p1326_p10 = scmp.lt.s32.totalorder %s1872_s26, %s1968_s2 }
 0x134   : > { %p1327_p11 = scmp.lt.s32.totalorder %s1325_s18, %s1321_s9 }
 0x135   : > { %p1323_p7 = pnand %p1322_p6, %p1480_p4 }
 0x136   : > { %p1328_p12 = por %p1327_p11, %p1326_p10 }
 0x137   : > { %p1324_p9 = pneg %p1323_p7 }
 0x139   : > { %p1329_p13 = pnand %p1328_p12, %p1324_p9 }
 0x13b   : > { %1332 = shalt.err (!%p1329_p13)
}
 0x13c   : > { %s1417_s28 = smov 128   ;;  %s1418_s29 = smov 8  }
 0x13d   : > { %1244 = dma.vmem_to_hbm [thread:$0]  (%p1480_p4), %s1879_s19, 4096, %s1872_s26, %s1019_s4, %s1417_s28, %s1417_s28, %s1418_s29  }
 0x13e   : > { %s1024_s5 = scalar_lea.sflag [#allocation5], %s1604_s8  ;;  %s1333_s6 = scalar_lea.vmem %s1888_s27, 4096 }
 0x13f   : > { %p1334_p0 = scmp.ne.s32.totalorder %s1888_s27, %s1333_s6  ;;  %s1419_s15 = smov [#allocation4]  }
 0x140   : > { %s1337_s7 = sshll.u32 %s1419_s15, 4  ;;  %s1338_s7 = int_to_ptr.vmem [resolvable:$false] %s1337_s7 }
 0x141   : > { %p1335_p1 = pnand %p1334_p0, %p1480_p4  ;;  %s1339_s9 = scalar_lea.vmem %s1338_s7, 8192 }
 0x142   : > { %p1340_p3 = scmp.lt.s32.totalorder %s1888_s27, %s1338_s7  ;;  %p1341_p5 = scmp.lt.s32.totalorder %s1339_s9, %s1333_s6 }
 0x143   : > { %p1336_p2 = pneg %p1335_p1 }
 0x144   : > { %p1342_p6 = por %p1341_p5, %p1340_p3 }
 0x146   : > { %p1343_p7 = pnand %p1342_p6, %p1336_p2 }
 0x148   : > { %1346 = shalt.err (!%p1343_p7)
}
 0x149   : > { %s1347_s19 = scalar_lea.hbm %s1886_s30, 4096  ;;  %s1351_s4 = scalar_lea.hbm %s1969_s3, 8192 }
 0x14a   : > { %p1348_p9 = scmp.ne.s32.totalorder %s1886_s30, %s1347_s19  ;;  %p1352_p12 = scmp.lt.s32.totalorder %s1886_s30, %s1969_s3 }
 0x14b   : > { %p1353_p13 = scmp.lt.s32.totalorder %s1351_s4, %s1347_s19 }
 0x14c   : > { %p1349_p10 = pnand %p1348_p9, %p1480_p4 }
 0x14d   : > { %p1354_p0 = por %p1353_p13, %p1352_p12 }
 0x14e   : > { %p1350_p11 = pneg %p1349_p10 }
 0x150   : > { %p1355_p1 = pnand %p1354_p0, %p1350_p11 }
 0x152   : > { %1358 = shalt.err (!%p1355_p1)
}
 0x153   : > { %1245 = dma.vmem_to_hbm [thread:$0]  (%p1480_p4), %s1888_s27, 4096, %s1886_s30, %s1024_s5, %s1417_s28, %s1417_s28, %s1418_s29  }
 0x154 PF: > { %p1255_p2 = scmp.ge.s32.totalorder %s1413_s17, 2  ;;  %s1074_s18 = sand.u32 1, %s1393_s12  }
 0x155   : > { %s1075_s21 = scalar_lea.sflag [#allocation3], %s1074_s18 }
 0x156   : > { %p1249_p3 = pnand %p1255_p2, %p1487_p8 }
 0x158   : > { %p1250_p5 = pneg %p1249_p3 }
 0x15a   : > { %1384 = dma.done.wait (%p1250_p5), %s1075_s21, 4096  }
 0x15b   : > { %1386 = vsyncadd (%p1250_p5), %s1075_s21, 4294963200  ;;  %s1084_s23 = scalar_lea.sflag [#allocation5], %s1074_s18 }
 0x15c   : > { %1388 = dma.done.wait (%p1250_p5), %s1084_s23, 4096  }
 0x15d   : > { %1390 = vsyncadd (%p1250_p5), %s1084_s23, 4294963200  ;;  %s20_s17 = sadd.s32 1, %s1413_s17   ;;  %s1972_s12 = smov %s1397_s13 }
 0x15e   : > { %p17_p6 = scmp.ge.s32.totalorder %s20_s17, 4   ;;  %s1973_s13 = smov %s1401_s14 }
 0x15f   : > { %s1974_s14 = smov %s1493_s25  ;;  %s1975_s15 = smov %s1409_s16 }
 0x160   : > { %s1976_s16 = smov %s1978_s20  ;;  %19 = sbr.rel (!%p17_p6) target bundleno = 6 (0x6), region = 83 }
 0x165   :  { %1089 = vsyncpa [#allocation3], 1 }
 0x166   :  { %1091 = vsyncpa [#allocation3 + $0x1], 1 }
 0x167   :  { %1092 = vsyncpa [#allocation5], 1 }
 0x168   :  { %1094 = vsyncpa [#allocation5 + $0x1], 1 }

</bundles_post_ra>
